<compile_context>
chip_gen: v7x
topology: tpu7x:2x2x1
jax: 0.10.0
libtpu: 0.0.40
codegen_flags: <defaults>
</compile_context>

<pallas_src>
import functools

import jax
import jax.numpy as jnp
from jax import lax
from jax.experimental import pallas as pl
from jax.experimental.pallas import tpu as pltpu


def _round_up(n: int, m: int) -> int:
    return ((n + m - 1) // m) * m


def _cdiv(a: int, b: int) -> int:
    return -(-a // b)


def encoder_kernel(x_ref, w1_ref, b1_ref, wcat_ref, bcat_ref, out_ref, acc_ref,
                   *, latent_dim: int):
    """Grid = (batch tiles, hidden tiles). Accumulates the fused projection."""
    k = pl.program_id(1)

    @pl.when(k == 0)
    def _():
        acc_ref[...] = jnp.zeros_like(acc_ref)

    # Partial hidden slab for this hidden tile: h_k = relu(x @ W1[:, k] + b1[k])
    # (bf16 or f32 operands, f32 MXU accumulation; epilogue in f32).
    h = jnp.dot(x_ref[...], w1_ref[...], preferred_element_type=jnp.float32)
    h = jnp.maximum(h + b1_ref[...], 0.0)

    # Accumulate the fused [mu | logvar] projection over hidden tiles.
    acc_ref[...] += jnp.dot(h.astype(wcat_ref.dtype), wcat_ref[...],
                            preferred_element_type=jnp.float32)

    @pl.when(k == pl.num_programs(1) - 1)
    def _():
        z = acc_ref[...] + bcat_ref[...]
        # Lanes [0, latent) carry mu; [latent, 2*latent) carry logvar.
        # sigma = exp(0.5*logvar) is applied via a lane mask (VPU select +
        # EUP exp, no cross-lane movement).  NOTE: exp is also evaluated on
        # the mu/pad lanes before `where` discards it -- benign (the finite
        # branch is selected); only a transient inf for |mu| > ~176.
        lane = lax.broadcasted_iota(jnp.int32, z.shape, dimension=1)
        out_ref[...] = jnp.where(lane < latent_dim, z,
                                 jnp.exp(0.5 * z)).astype(out_ref.dtype)


def encoder_forward(x, w1, b1, wmu, bmu, wlv, blv, *,
                    matmul_dtype=jnp.bfloat16, max_tile_b: int = 1024):
    """x: [B, input_dim]; weights [in, out]; biases [1, out] -> (mu, sigma)."""
    B, input_dim = x.shape
    hidden_dim = w1.shape[1]
    latent_dim = wmu.shape[1]

    # ---- hardware-friendly padded shapes (256-aligned for v6e/v7x MXU) ----
    in_p = _round_up(input_dim, 256)
    hid_p = _round_up(hidden_dim, 256)
    # Lane-dense output slab width for [mu | sigma | pad].
    out_p = _round_up(2 * latent_dim, 256) if 2 * latent_dim > 128 else 128

    # Hidden reduction tile (grid axis 1): keeps per-step weight blocks a few
    # MiB so large hidden_dim streams instead of OOM'ing VMEM.
    if hid_p <= 512:
        t_hid = hid_p
    else:
        t_hid = 512
        hid_p = _round_up(hid_p, t_hid)
    nk = hid_p // t_hid

    # Batch tile: ~2 MiB per in-flight x buffer (amortizes ~0.35us/step grid
    # overhead; skinny inputs want 512+ rows), capped so wide inputs fit the
    # scoped-VMEM budget and so the batch grid has >=2 steps whenever B allows
    # (the batch axis is the only "parallel" axis -> both TCs on v7x get work).
    mm_bytes = jnp.dtype(matmul_dtype).itemsize
    tb = (2 << 20) // max(in_p * mm_bytes, 1)
    tb = max(128, min(max_tile_b, tb))
    tb = min(tb, _round_up(B, 8))
    if B > 8:
        tb = min(tb, _round_up(_cdiv(B, 2), 8))
    tb = _round_up(tb, 8)
    b_p = _round_up(B, tb)

    # ---- wrapper-side padding / dtype prep (one-time) ----------------------
    f32 = jnp.float32
    x_p = jnp.zeros((b_p, in_p), matmul_dtype).at[:B, :input_dim].set(
        x.astype(matmul_dtype))
    w1_p = jnp.zeros((in_p, hid_p), matmul_dtype).at[:input_dim, :hidden_dim].set(
        w1.astype(matmul_dtype))
    b1_p = jnp.zeros((1, hid_p), f32).at[:, :hidden_dim].set(
        b1.reshape(1, -1).astype(f32))

    # Fuse mu / logvar projections: one [hid, 2*latent] weight + one bias row.
    wcat = jnp.concatenate([wmu, wlv], axis=1).astype(matmul_dtype)
    bcat = jnp.concatenate([bmu.reshape(1, -1), blv.reshape(1, -1)],
                           axis=1).astype(f32)
    wcat_p = jnp.zeros((hid_p, out_p), matmul_dtype).at[
        :hidden_dim, :2 * latent_dim].set(wcat)
    bcat_p = jnp.zeros((1, out_p), f32).at[:, :2 * latent_dim].set(bcat)

    # ---- BlockSpecs ---------------------------------------------------------
    single = pl.Buffered(1)

    def weight_spec(shape, idx):
        # With a single hidden step the block index is constant: single-buffer
        # so the weights don't count twice against VMEM.  With multiple hidden
        # steps keep the default double-buffer so weight DMA pipelines.
        if nk == 1:
            return pl.BlockSpec(shape, idx, pipeline_mode=single)
        return pl.BlockSpec(shape, idx)

    in_specs = [
        # x: streamed over batch, resident across the hidden axis.
        # TODO(synk): sweep pipeline_mode=pl.Buffered(3) here on v7x if x DMA
        # issue latency shows up (3.2 TB/s HBM, short per-step compute).
        pl.BlockSpec((tb, in_p), lambda i, k: (i, 0)),
        weight_spec((in_p, t_hid), lambda i, k: (0, k)),
        weight_spec((1, t_hid), lambda i, k: (0, k)),
        weight_spec((t_hid, out_p), lambda i, k: (k, 0)),
        pl.BlockSpec((1, out_p), lambda i, k: (0, 0), pipeline_mode=single),
    ]
    out_spec = pl.BlockSpec((tb, out_p), lambda i, k: (i, 0))

    # ---- explicit scoped-VMEM budget ---------------------------------------
    buf_w = 1 if nk == 1 else 2
    footprint = (
        2 * tb * in_p * mm_bytes              # x (double-buffered)
        + buf_w * in_p * t_hid * mm_bytes     # W1 tile(s)
        + buf_w * t_hid * 4                   # b1 tile(s), f32
        + buf_w * t_hid * out_p * mm_bytes    # Wcat tile(s)
        + out_p * 4                           # bcat (single-buffered)
        + 2 * tb * out_p * 4                  # out slab (double-buffered)
        + tb * out_p * 4                      # acc scratch
    )
    # Defaults (16 MiB v5e / 32 MiB v6e+v7x) are easily exceeded by resident
    # weights; cap under ~96 MiB so v5e/v6e fit (on v7x the hidden tiling
    # keeps the footprint itself well under 64 MiB/TC).
    vmem_limit = int(min(max(2 * footprint + (4 << 20), 32 << 20), 96 << 20))

    kernel = functools.partial(encoder_kernel, latent_dim=latent_dim)
    out = pl.pallas_call(
        kernel,
        out_shape=jax.ShapeDtypeStruct((b_p, out_p), jnp.float32),
        grid_spec=pltpu.PrefetchScalarGridSpec(
            num_scalar_prefetch=0,
            grid=(b_p // tb, nk),
            in_specs=in_specs,
            out_specs=out_spec,
            scratch_shapes=[pltpu.VMEM((tb, out_p), jnp.float32)],
        ),
        compiler_params=pltpu.CompilerParams(
            dimension_semantics=("parallel", "arbitrary"),
            vmem_limit_bytes=vmem_limit,
        ),
    )(x_p, w1_p, b1_p, wcat_p, bcat_p)

    mu = out[:B, :latent_dim]
    sigma = out[:B, latent_dim:2 * latent_dim]
    return mu, sigma


def encoder_reference(x, w1, b1, wmu, bmu, wlv, blv):
    h = jnp.maximum(x @ w1 + b1, 0.0)
    mu = h @ wmu + bmu
    logvar = h @ wlv + blv
    return mu, jnp.exp(0.5 * logvar)


if __name__ == "__main__":
    # Small shapes consistent with Encoder(input_dim, hidden_dim, latent_dim).
    B, input_dim, hidden_dim, latent_dim = 8, 16, 32, 8

    key = jax.random.PRNGKey(0)
    kx, k1, k2, k3, k4, k5, k6 = jax.random.split(key, 7)

    x = jax.random.normal(kx, (B, input_dim), dtype=jnp.float32)

    # Deterministic parameter init (scaled normals), stored [in, out] / [1, out].
    w1 = jax.random.normal(k1, (input_dim, hidden_dim), dtype=jnp.float32) * 0.1
    b1 = jax.random.normal(k2, (1, hidden_dim), dtype=jnp.float32) * 0.1
    wmu = jax.random.normal(k3, (hidden_dim, latent_dim), dtype=jnp.float32) * 0.1
    bmu = jax.random.normal(k4, (1, latent_dim), dtype=jnp.float32) * 0.1
    wlv = jax.random.normal(k5, (hidden_dim, latent_dim), dtype=jnp.float32) * 0.1
    blv = jax.random.normal(k6, (1, latent_dim), dtype=jnp.float32) * 0.1

    mu_ref, sigma_ref = encoder_reference(x, w1, b1, wmu, bmu, wlv, blv)

    # f32 matmul path: tight correctness check against the reference.
    mu, sigma = encoder_forward(x, w1, b1, wmu, bmu, wlv, blv,
                                matmul_dtype=jnp.float32)
    jax.block_until_ready((mu, sigma))
    assert mu.shape == (B, latent_dim) and sigma.shape == (B, latent_dim)
    assert jnp.allclose(mu, mu_ref, atol=1e-5, rtol=1e-5)
    assert jnp.allclose(sigma, sigma_ref, atol=1e-5, rtol=1e-5)

    # bf16 matmul path (default / MXU-peak): looser tolerance vs f32 reference.
    mu_bf, sigma_bf = encoder_forward(x, w1, b1, wmu, bmu, wlv, blv)
    jax.block_until_ready((mu_bf, sigma_bf))
    assert mu_bf.shape == (B, latent_dim) and sigma_bf.shape == (B, latent_dim)
    assert jnp.allclose(mu_bf, mu_ref, atol=3e-2, rtol=3e-2)
    assert jnp.allclose(sigma_bf, sigma_ref, atol=3e-2, rtol=3e-2)

    print("KERNEL_OK")
</pallas_src>

<mosaic_0001>
module attributes {stable_mosaic.version = 11 : i64} {
  func.func @encoder_kernel(%arg0: i32, %arg1: i32, %arg2: memref<8x256xf32, #tpu.memory_space<vmem>>, %arg3: memref<256x256xf32, #tpu.memory_space<vmem>>, %arg4: memref<1x256xf32, #tpu.memory_space<vmem>>, %arg5: memref<256x128xf32, #tpu.memory_space<vmem>>, %arg6: memref<1x128xf32, #tpu.memory_space<vmem>>, %arg7: memref<8x128xf32, #tpu.memory_space<vmem>>, %arg8: memref<8x128xf32, #tpu.memory_space<vmem>>) attributes {dimension_semantics = [#tpu.dimension_semantics<parallel>, #tpu.dimension_semantics<arbitrary>], iteration_bounds = array<i64: 1, 1>, scalar_prefetch = 0 : i64, scratch_operands = 1 : i64, tpu.core_type = #tpu.core_type<tc>, window_params = [{transform_indices = @transform_0, window_bounds = array<i64: 8, 256>}, {pipeline_mode = #tpu.pipeline_mode<synchronous>, transform_indices = @transform_1, window_bounds = array<i64: 256, 256>}, {pipeline_mode = #tpu.pipeline_mode<synchronous>, transform_indices = @transform_2, window_bounds = array<i64: 1, 256>}, {pipeline_mode = #tpu.pipeline_mode<synchronous>, transform_indices = @transform_3, window_bounds = array<i64: 256, 128>}, {pipeline_mode = #tpu.pipeline_mode<synchronous>, transform_indices = @transform_4, window_bounds = array<i64: 1, 128>}, {transform_indices = @transform_5, window_bounds = array<i64: 8, 128>}]} {
    %c0_i32 = arith.constant 0 : i32
    %0 = arith.cmpi eq, %arg1, %c0_i32 : i32
    %1 = arith.extui %0 : i1 to i32
    %c0_i32_0 = arith.constant 0 : i32
    %2 = arith.cmpi ne, %1, %c0_i32_0 : i32
    scf.if %2 {
      %cst_16 = arith.constant 0.000000e+00 : f32
      %19 = vector.broadcast %cst_16 : f32 to vector<8x128xf32>
      %c0_17 = arith.constant 0 : index
      %c0_18 = arith.constant 0 : index
      %20 = vector.load %arg8[%c0_17, %c0_18] : memref<8x128xf32, #tpu.memory_space<vmem>>, vector<8x128xf32>
      tpu.vector_store %arg8[%c0_17, %c0_18], %19 {strides = array<i32>} : memref<8x128xf32, #tpu.memory_space<vmem>>, vector<8x128xf32>,
    } else {
    }
    %c0 = arith.constant 0 : index
    %c0_1 = arith.constant 0 : index
    %3 = vector.load %arg2[%c0, %c0_1] : memref<8x256xf32, #tpu.memory_space<vmem>>, vector<8x256xf32>
    %c0_2 = arith.constant 0 : index
    %c0_3 = arith.constant 0 : index
    %4 = vector.load %arg3[%c0_2, %c0_3] : memref<256x256xf32, #tpu.memory_space<vmem>>, vector<256x256xf32>
    %cst = arith.constant dense<0.000000e+00> : vector<8x256xf32>
    %5 = tpu.matmul %3, %4, %cst {dimension_numbers = #tpu.dot_dimension_numbers<[1], [0], [0], [1], [0, 0, 1, 1], [], []>} : vector<8x256xf32>, vector<256x256xf32>, vector<8x256xf32> -> vector<8x256xf32>
    %c0_4 = arith.constant 0 : index
    %c0_5 = arith.constant 0 : index
    %6 = vector.load %arg4[%c0_4, %c0_5] : memref<1x256xf32, #tpu.memory_space<vmem>>, vector<1x256xf32>
    %7 = vector.broadcast %6 : vector<1x256xf32> to vector<8x256xf32>
    %8 = arith.addf %5, %7 : vector<8x256xf32>
    %cst_6 = arith.constant 0.000000e+00 : f32
    %9 = vector.broadcast %cst_6 : f32 to vector<8x256xf32>
    %10 = arith.maximumf %8, %9 : vector<8x256xf32>
    %c0_7 = arith.constant 0 : index
    %c0_8 = arith.constant 0 : index
    %11 = vector.load %arg8[%c0_7, %c0_8] : memref<8x128xf32, #tpu.memory_space<vmem>>, vector<8x128xf32>
    %c0_9 = arith.constant 0 : index
    %c0_10 = arith.constant 0 : index
    %12 = vector.load %arg5[%c0_9, %c0_10] : memref<256x128xf32, #tpu.memory_space<vmem>>, vector<256x128xf32>
    %cst_11 = arith.constant dense<0.000000e+00> : vector<8x128xf32>
    %13 = tpu.matmul %10, %12, %cst_11 {dimension_numbers = #tpu.dot_dimension_numbers<[1], [0], [0], [1], [0, 0, 1, 1], [], []>} : vector<8x256xf32>, vector<256x128xf32>, vector<8x128xf32> -> vector<8x128xf32>
    %14 = arith.addf %11, %13 : vector<8x128xf32>
    %c0_12 = arith.constant 0 : index
    %c0_13 = arith.constant 0 : index
    %15 = vector.load %arg8[%c0_12, %c0_13] : memref<8x128xf32, #tpu.memory_space<vmem>>, vector<8x128xf32>
    tpu.vector_store %arg8[%c0_12, %c0_13], %14 {strides = array<i32>} : memref<8x128xf32, #tpu.memory_space<vmem>>, vector<8x128xf32>,
    %c0_i32_14 = arith.constant 0 : i32
    %16 = arith.cmpi eq, %arg1, %c0_i32_14 : i32
    %17 = arith.extui %16 : i1 to i32
    %c0_i32_15 = arith.constant 0 : i32
    %18 = arith.cmpi ne, %17, %c0_i32_15 : i32
    scf.if %18 {
      %c0_16 = arith.constant 0 : index
      %c0_17 = arith.constant 0 : index
      %19 = vector.load %arg8[%c0_16, %c0_17] : memref<8x128xf32, #tpu.memory_space<vmem>>, vector<8x128xf32>
      %c0_18 = arith.constant 0 : index
      %c0_19 = arith.constant 0 : index
      %20 = vector.load %arg6[%c0_18, %c0_19] : memref<1x128xf32, #tpu.memory_space<vmem>>, vector<1x128xf32>
      %21 = vector.broadcast %20 : vector<1x128xf32> to vector<8x128xf32>
      %22 = arith.addf %19, %21 : vector<8x128xf32>
      %23 = tpu.iota {dimensions = array<i32: 1>} : vector<8x128xi32>
      %c8_i32 = arith.constant 8 : i32
      %24 = vector.broadcast %c8_i32 : i32 to vector<8x128xi32>
      %25 = arith.cmpi slt, %23, %24 : vector<8x128xi32>
      %cst_20 = arith.constant 5.000000e-01 : f32
      %26 = vector.broadcast %cst_20 : f32 to vector<8x128xf32>
      %27 = arith.mulf %26, %22 : vector<8x128xf32>
      %28 = math.exp %27 : vector<8x128xf32>
      %29 = arith.select %25, %22, %28 : vector<8x128xi1>, vector<8x128xf32>
      %c0_21 = arith.constant 0 : index
      %c0_22 = arith.constant 0 : index
      %30 = vector.load %arg7[%c0_21, %c0_22] : memref<8x128xf32, #tpu.memory_space<vmem>>, vector<8x128xf32>
      tpu.vector_store %arg7[%c0_21, %c0_22], %29 {strides = array<i32>} : memref<8x128xf32, #tpu.memory_space<vmem>>, vector<8x128xf32>,
    } else {
    }
    return
  }
  func.func @transform_0(%arg0: i32, %arg1: i32) -> (i32, i32) {
    %c0_i32 = arith.constant 0 : i32
    %c0_i32_0 = arith.constant 0 : i32
    return %arg0, %c0_i32 : i32, i32
  }
  func.func @transform_1(%arg0: i32, %arg1: i32) -> (i32, i32) {
    %c0_i32 = arith.constant 0 : i32
    %c0_i32_0 = arith.constant 0 : i32
    return %c0_i32, %arg1 : i32, i32
  }
  func.func @transform_2(%arg0: i32, %arg1: i32) -> (i32, i32) {
    %c0_i32 = arith.constant 0 : i32
    %c0_i32_0 = arith.constant 0 : i32
    return %c0_i32, %arg1 : i32, i32
  }
  func.func @transform_3(%arg0: i32, %arg1: i32) -> (i32, i32) {
    %c0_i32 = arith.constant 0 : i32
    %c0_i32_0 = arith.constant 0 : i32
    return %arg1, %c0_i32 : i32, i32
  }
  func.func @transform_4(%arg0: i32, %arg1: i32) -> (i32, i32) {
    %c0_i32 = arith.constant 0 : i32
    %c0_i32_0 = arith.constant 0 : i32
    %c0_i32_1 = arith.constant 0 : i32
    return %c0_i32, %c0_i32_0 : i32, i32
  }
  func.func @transform_5(%arg0: i32, %arg1: i32) -> (i32, i32) {
    %c0_i32 = arith.constant 0 : i32
    %c0_i32_0 = arith.constant 0 : i32
    return %arg0, %c0_i32 : i32, i32
  }
}

</mosaic_0001>

<bundles_post_ra>
// kernel: tpu_custom_call.1
= control target key start
LH: loop header
LB: loop body
LE: loop exit
PB: predicated region body
PF: predicated region fallthrough
CT: control target
= control target key end

     0   :  { %10 = vsyncpa [#allocation4], 0  ;;  %s685_s0 = inlined_call_operand.hbm [shape: f32[8,256], index: 0, kind: input, shape index: {}]   ;;  %s686_s1 = inlined_call_operand.hbm [shape: f32[256,256], index: 1, kind: input, shape index: {}]   ;;  %s687_s2 = inlined_call_operand.vmem [shape: f32[1,256], index: 2, kind: input, shape index: {}]   ;;  %s688_s3 = inlined_call_operand.hbm [shape: f32[256,128], index: 3, kind: input, shape index: {}]   ;;  %s689_s4 = inlined_call_operand.vmem [shape: f32[1,128], index: 4, kind: input, shape index: {}]   ;;  %s690_s5 = inlined_call_operand.hbm [shape: f32[8,128], index: 5, kind: output, shape index: {}]  }
   0x1   :  { %11 = vsyncpa [#allocation7], 0 }
   0x2   :  { %12 = vsyncpa [#allocation5], 0  ;;  %s593_s18 = smov [#allocation6]   ;;  %s499_s22 = scalar_lea.hbm %s686_s1, 8192 }
   0x3   :  { %s28_s19 = sshll.u32 %s593_s18, 4  ;;  %p500_p0 = scmp.ne.s32.totalorder %s686_s1, %s499_s22  ;;  %s29_s19 = int_to_ptr.vmem [resolvable:$true] %s28_s19 }
   0x4   :  { %p503_p1 = scmp.lt.u32.totalorder %s499_s22, %s686_s1 }
   0x6   :  { %p505_p2 = pnand %p503_p1, %p500_p0 }
   0x8   :  { %508 = shalt.err (!%p505_p2)
}
   0x9   :  { %s509_s27 = scalar_lea.vmem %s29_s19, 8192  ;;  %p514_p4 = scmp.lt.s32.totalorder %s29_s19, %s29_s19 }
   0xa   :  { %p510_p3 = scmp.ne.s32.totalorder %s29_s19, %s509_s27  ;;  %p515_p5 = scmp.lt.s32.totalorder %s509_s27, %s509_s27 }
   0xc   :  { %p516_p6 = por %p515_p5, %p514_p4 }
   0xe   :  { %p517_p7 = pnand %p516_p6, %p510_p3 }
  0x10   :  { %520 = shalt.err (!%p517_p7)
}
  0x11   :  { %s594_s28 = smov 256   ;;  %s595_s29 = smov 16  }
  0x12   :  { %34 = dma.hbm_to_vmem [thread:$0]  %s686_s1, 8192, %s29_s19, [#allocation7], %s594_s28, %s594_s28, %s595_s29  }
  0x13   :  { %s596_s7 = smov [#allocation3]   ;;  %s597_s9 = smov [#allocation8]  }
  0x14   :  { %s19_s8 = sshll.u32 %s596_s7, 4  ;;  %s42_s10 = sshll.u32 %s597_s9, 4  ;;  %s20_s8 = int_to_ptr.vmem [resolvable:$true] %s19_s8  ;;  %s43_s10 = int_to_ptr.vmem [resolvable:$true] %s42_s10 }
  0x15   :  { %s521_s13 = scalar_lea.hbm %s685_s0, 256 }
  0x16   :  { %p522_p8 = scmp.ne.s32.totalorder %s685_s0, %s521_s13  ;;  %p525_p9 = scmp.lt.u32.totalorder %s521_s13, %s685_s0 }
  0x18   :  { %p527_p10 = pnand %p525_p9, %p522_p8 }
  0x1a   :  { %530 = shalt.err (!%p527_p10)
}
  0x1b   :  { %s531_s1 = scalar_lea.vmem %s20_s8, 256  ;;  %p536_p12 = scmp.lt.s32.totalorder %s20_s8, %s20_s8 }
  0x1c   :  { %p532_p11 = scmp.ne.s32.totalorder %s20_s8, %s531_s1  ;;  %p537_p13 = scmp.lt.s32.totalorder %s531_s1, %s531_s1 }
  0x1e   :  { %p538_p0 = por %p537_p13, %p536_p12 }
  0x20   :  { %p539_p1 = pnand %p538_p0, %p532_p11 }
  0x22   :  { %542 = shalt.err (!%p539_p1)
}
  0x23   :  { %22 = dma.hbm_to_vmem [thread:$0]  %s685_s0, 256, %s20_s8, [#allocation4]  }
  0x24   :  { %s543_s22 = scalar_lea.hbm %s688_s3, 4096 }
  0x25   :  { %p544_p2 = scmp.ne.s32.totalorder %s688_s3, %s543_s22  ;;  %p547_p3 = scmp.lt.u32.totalorder %s543_s22, %s688_s3 }
  0x27   :  { %p549_p4 = pnand %p547_p3, %p544_p2 }
  0x29   :  { %552 = shalt.err (!%p549_p4)
}
  0x2a   :  { %s553_s27 = scalar_lea.vmem %s43_s10, 4096  ;;  %p558_p6 = scmp.lt.s32.totalorder %s43_s10, %s43_s10 }
  0x2b   :  { %p554_p5 = scmp.ne.s32.totalorder %s43_s10, %s553_s27  ;;  %p559_p7 = scmp.lt.s32.totalorder %s553_s27, %s553_s27 }
  0x2d   :  { %p560_p8 = por %p559_p7, %p558_p6 }
  0x2f   :  { %p561_p9 = pnand %p560_p8, %p554_p5 }
  0x31   :  { %564 = shalt.err (!%p561_p9)
}
  0x32   :  { %s598_s0 = smov 128   ;;  %s599_s28 = smov 8  }
  0x33   :  { %48 = dma.hbm_to_vmem [thread:$0]  %s688_s3, 4096, %s43_s10, [#allocation7], %s598_s0, %s598_s0, %s599_s28  }
  0x34   :  { %587 = dma.done.wait [#allocation4], 256  }
  0x35   :  { %588 = vsyncadd [#allocation4], 4294967040 }
  0x36   :  { %589 = dma.done.wait [#allocation7], 12288  }
  0x37   :  { %590 = vsyncadd [#allocation7], 4294955008  ;;  %v68_v0 = vld [vmem:[#allocation6 + $0x8] sm:$0xff]  ;;  %v70_v1 = vld [vmem:[#allocation6 + $0x18] sm:$0xff] }
  0x38   :  { %v67_v2 = vld [vmem:[#allocation6] sm:$0xff]  ;;  %v393_v3 = vpack.c.bf16 %v70_v1, %v68_v0  ;;  %v69_v4 = vld [vmem:[#allocation6 + $0x10] sm:$0xff]  ;;  %v72_v5 = vld [vmem:[#allocation6 + $0x28] sm:$0xff] }
  0x39   :  { %v74_v6 = vld [vmem:[#allocation6 + $0x38] sm:$0xff]  ;;  %v395_v7 = vpack.c.bf16 %v69_v4, %v67_v2  ;;  %v71_v9 = vld [vmem:[#allocation6 + $0x20] sm:$0xff]  ;;  %v73_v10 = vld [vmem:[#allocation6 + $0x30] sm:$0xff] }
  0x3a   :  { %v397_v8 = vpack.c.bf16 %v74_v6, %v72_v5  ;;  %v76_v11 = vld [vmem:[#allocation6 + $0x48] sm:$0xff]  ;;  %394 = vmatprep.subr.bf16.mxu0 %v393_v3  ;;  %v78_v12 = vld [vmem:[#allocation6 + $0x58] sm:$0xff]  ;;  %v399_v13 = vpack.c.bf16 %v73_v10, %v71_v9  ;;  %v75_v15 = vld [vmem:[#allocation6 + $0x40] sm:$0xff] }
  0x3b   :  { %396 = vmatpush1.bf16.msra.mxu0 %v395_v7  ;;  %v401_v14 = vpack.c.bf16 %v78_v12, %v76_v11  ;;  %v77_v16 = vld [vmem:[#allocation6 + $0x50] sm:$0xff]  ;;  %v80_v17 = vld [vmem:[#allocation6 + $0x68] sm:$0xff]  ;;  %v82_v18 = vld [vmem:[#allocation6 + $0x78] sm:$0xff] }
  0x3c   :  { %398 = vmatprep.subr.bf16.mxu0 %v397_v8  ;;  %v403_v19 = vpack.c.bf16 %v77_v16, %v75_v15  ;;  %v405_v20 = vpack.c.bf16 %v82_v18, %v80_v17  ;;  %v79_v21 = vld [vmem:[#allocation6 + $0x60] sm:$0xff]  ;;  %v81_v22 = vld [vmem:[#allocation6 + $0x70] sm:$0xff]  ;;  %v84_v23 = vld [vmem:[#allocation6 + $0x88] sm:$0xff] }
  0x3d   :  { %v86_v24 = vld [vmem:[#allocation6 + $0x98] sm:$0xff]  ;;  %v407_v25 = vpack.c.bf16 %v81_v22, %v79_v21  ;;  %v83_v27 = vld [vmem:[#allocation6 + $0x80] sm:$0xff]  ;;  %v85_v28 = vld [vmem:[#allocation6 + $0x90] sm:$0xff] }
  0x3e   :  { %v409_v26 = vpack.c.bf16 %v86_v24, %v84_v23  ;;  %v88_v29 = vld [vmem:[#allocation6 + $0xa8] sm:$0xff]  ;;  %v90_v30 = vld [vmem:[#allocation6 + $0xb8] sm:$0xff]  ;;  %v411_v31 = vpack.c.bf16 %v85_v28, %v83_v27  ;;  %v87_v33 = vld [vmem:[#allocation6 + $0xa0] sm:$0xff] }
  0x3f   :  { %400 = vmatpush1.bf16.msra.mxu0 %v399_v13  ;;  %v413_v32 = vpack.c.bf16 %v90_v30, %v88_v29  ;;  %v89_v34 = vld [vmem:[#allocation6 + $0xb0] sm:$0xff]  ;;  %v92_v35 = vld [vmem:[#allocation6 + $0xc8] sm:$0xff]  ;;  %v94_v36 = vld [vmem:[#allocation6 + $0xd8] sm:$0xff] }
  0x40   :  { %402 = vmatprep.subr.bf16.mxu0 %v401_v14  ;;  %v415_v37 = vpack.c.bf16 %v89_v34, %v87_v33  ;;  %v91_v38 = vld [vmem:[#allocation6 + $0xc0] sm:$0xff]  ;;  %v93_v39 = vld [vmem:[#allocation6 + $0xd0] sm:$0xff]  ;;  %v417_v40 = vpack.c.bf16 %v94_v36, %v92_v35  ;;  %v96_v41 = vld [vmem:[#allocation6 + $0xe8] sm:$0xff] }
  0x41   :  { %v98_v42 = vld [vmem:[#allocation6 + $0xf8] sm:$0xff]  ;;  %v233_v44 = vld [vmem:[#allocation8 + $0x80] sm:$0xff]  ;;  %v234_v45 = vld [vmem:[#allocation8 + $0x88] sm:$0xff]  ;;  %v419_v51 = vpack.c.bf16 %v93_v39, %v91_v38 }
  0x42   :  { %v66_v43 = vld [vmem:[#allocation3 + $0x8] sm:$0xff]  ;;  %v217_v46 = vld [vmem:[#allocation8] sm:$0xff]  ;;  %v457_v47 = vpack.c.bf16 %v234_v45, %v233_v44  ;;  %v218_v48 = vld [vmem:[#allocation8 + $0x8] sm:$0xff]  ;;  %v421_v57 = vpack.c.bf16 %v98_v42, %v96_v41 }
  0x43   :  { %404 = vmatpush1.bf16.msra.mxu0 %v403_v19  ;;  %207 = vmatprep.mubr.f32.mxu0 %v66_v43  ;;  %v235_v49 = vld [vmem:[#allocation8 + $0x90] sm:$0xff]  ;;  %v236_v50 = vld [vmem:[#allocation8 + $0x98] sm:$0xff]  ;;  %v459_v52 = vpack.c.bf16 %v218_v48, %v217_v46  ;;  %v237_v56 = vld [vmem:[#allocation8 + $0xa0] sm:$0xff] }
  0x44   :  { %406 = vmatprep.subr.bf16.mxu0 %v405_v20  ;;  %v461_v53 = vpack.c.bf16 %v236_v50, %v235_v49  ;;  %v219_v54 = vld [vmem:[#allocation8 + $0x10] sm:$0xff]  ;;  %v220_v55 = vld [vmem:[#allocation8 + $0x18] sm:$0xff]  ;;  %v95_v58 = vld [vmem:[#allocation6 + $0xe0] sm:$0xff]  ;;  %458 = vmatprep.subr.bf16.mxu1 %v457_v47 }
  0x45   :  { %v97_v59 = vld [vmem:[#allocation6 + $0xf0] sm:$0xff]  ;;  %v238_v60 = vld [vmem:[#allocation8 + $0xa8] sm:$0xff]  ;;  %v102_v62 = vld [vmem:[#allocation6 + $0x118] sm:$0xff]  ;;  %460 = vmatpush3.bf16.msra.mxu1 %v459_v52  ;;  %v463_v63 = vpack.c.bf16 %v220_v55, %v219_v54 }
  0x46   :  { %v100_v61 = vld [vmem:[#allocation6 + $0x108] sm:$0xff]  ;;  %462 = vmatprep.subr.bf16.mxu1 %v461_v53  ;;  %v465_v0 = vpack.c.bf16 %v238_v60, %v237_v56  ;;  %v221_v1 = vld [vmem:[#allocation8 + $0x20] sm:$0xff]  ;;  %v423_v3 = vpack.c.bf16 %v97_v59, %v95_v58  ;;  %v239_v4 = vld [vmem:[#allocation8 + $0xb0] sm:$0xff] }
  0x47   :  { %408 = vmatpush1.bf16.msra.mxu0 %v407_v25  ;;  %v222_v2 = vld [vmem:[#allocation8 + $0x28] sm:$0xff]  ;;  %v240_v5 = vld [vmem:[#allocation8 + $0xb8] sm:$0xff]  ;;  %v425_v6 = vpack.c.bf16 %v102_v62, %v100_v61  ;;  %v99_v7 = vld [vmem:[#allocation6 + $0x100] sm:$0xff] }
  0x48   :  { %410 = vmatprep.subr.bf16.mxu0 %v409_v26  ;;  %v101_v8 = vld [vmem:[#allocation6 + $0x110] sm:$0xff]  ;;  %v104_v9 = vld [vmem:[#allocation6 + $0x128] sm:$0xff]  ;;  %v106_v10 = vld [vmem:[#allocation6 + $0x138] sm:$0xff]  ;;  %v467_v11 = vpack.c.bf16 %v222_v2, %v221_v1  ;;  %v469_v12 = vpack.c.bf16 %v240_v5, %v239_v4 }
  0x49   :  { %464 = vmatpush3.bf16.msra.mxu1 %v463_v63  ;;  %v223_v13 = vld [vmem:[#allocation8 + $0x30] sm:$0xff]  ;;  %v224_v14 = vld [vmem:[#allocation8 + $0x38] sm:$0xff]  ;;  %v427_v15 = vpack.c.bf16 %v101_v8, %v99_v7  ;;  %v241_v16 = vld [vmem:[#allocation8 + $0xc0] sm:$0xff]  ;;  %v429_v18 = vpack.c.bf16 %v106_v10, %v104_v9 }
  0x4a   :  { %466 = vmatprep.subr.bf16.mxu1 %v465_v0  ;;  %v242_v17 = vld [vmem:[#allocation8 + $0xc8] sm:$0xff]  ;;  %v103_v19 = vld [vmem:[#allocation6 + $0x120] sm:$0xff]  ;;  %v105_v20 = vld [vmem:[#allocation6 + $0x130] sm:$0xff]  ;;  %v471_v23 = vpack.c.bf16 %v224_v14, %v223_v13 }
  0x4b   :  { %412 = vmatpush1.bf16.msra.mxu0 %v411_v31  ;;  %v108_v21 = vld [vmem:[#allocation6 + $0x148] sm:$0xff]  ;;  %v110_v22 = vld [vmem:[#allocation6 + $0x158] sm:$0xff]  ;;  %v473_v24 = vpack.c.bf16 %v242_v17, %v241_v16  ;;  %v225_v25 = vld [vmem:[#allocation8 + $0x40] sm:$0xff]  ;;  %v431_v27 = vpack.c.bf16 %v105_v20, %v103_v19 }
  0x4c   :  { %414 = vmatprep.subr.bf16.mxu0 %v413_v32  ;;  %v226_v26 = vld [vmem:[#allocation8 + $0x48] sm:$0xff]  ;;  %v243_v28 = vld [vmem:[#allocation8 + $0xd0] sm:$0xff]  ;;  %v244_v29 = vld [vmem:[#allocation8 + $0xd8] sm:$0xff]  ;;  %v433_v30 = vpack.c.bf16 %v110_v22, %v108_v21 }
  0x4d   :  { %468 = vmatpush3.bf16.msra.mxu1 %v467_v11  ;;  %v107_v31 = vld [vmem:[#allocation6 + $0x140] sm:$0xff]  ;;  %v109_v32 = vld [vmem:[#allocation6 + $0x150] sm:$0xff]  ;;  %v112_v33 = vld [vmem:[#allocation6 + $0x168] sm:$0xff]  ;;  %v475_v35 = vpack.c.bf16 %v226_v26, %v225_v25  ;;  %v477_v36 = vpack.c.bf16 %v244_v29, %v243_v28 }
  0x4e   :  { %470 = vmatprep.subr.bf16.mxu1 %v469_v12  ;;  %v114_v34 = vld [vmem:[#allocation6 + $0x178] sm:$0xff]  ;;  %v435_v39 = vpack.c.bf16 %v109_v32, %v107_v31  ;;  %v246_v41 = vld [vmem:[#allocation8 + $0xe8] sm:$0xff]  ;;  %v111_v43 = vld [vmem:[#allocation6 + $0x160] sm:$0xff] }
  0x4f   :  { %416 = vmatpush1.bf16.msra.mxu0 %v415_v37  ;;  %v227_v37 = vld [vmem:[#allocation8 + $0x50] sm:$0xff]  ;;  %v228_v38 = vld [vmem:[#allocation8 + $0x58] sm:$0xff]  ;;  %v437_v42 = vpack.c.bf16 %v114_v34, %v112_v33  ;;  %v116_v45 = vld [vmem:[#allocation6 + $0x188] sm:$0xff] }
  0x50   :  { %418 = vmatprep.subr.bf16.mxu0 %v417_v40  ;;  %v245_v40 = vld [vmem:[#allocation8 + $0xe0] sm:$0xff]  ;;  %v113_v44 = vld [vmem:[#allocation6 + $0x170] sm:$0xff]  ;;  %v118_v46 = vld [vmem:[#allocation6 + $0x198] sm:$0xff]  ;;  %v479_v47 = vpack.c.bf16 %v228_v38, %v227_v37 }
  0x51   :  { %472 = vmatpush3.bf16.msra.mxu1 %v471_v23  ;;  %v481_v48 = vpack.c.bf16 %v246_v41, %v245_v40  ;;  %v439_v49 = vpack.c.bf16 %v113_v44, %v111_v43  ;;  %v441_v50 = vpack.c.bf16 %v118_v46, %v116_v45  ;;  %v117_v52 = vld [vmem:[#allocation6 + $0x190] sm:$0xff]  ;;  %v120_v53 = vld [vmem:[#allocation6 + $0x1a8] sm:$0xff]  ;;  %v122_v54 = vld [vmem:[#allocation6 + $0x1b8] sm:$0xff] }
  0x52   :  { %474 = vmatprep.subr.bf16.mxu1 %v473_v24  ;;  %v445_v56 = vpack.c.bf16 %v122_v54, %v120_v53  ;;  %v121_v58 = vld [vmem:[#allocation6 + $0x1b0] sm:$0xff]  ;;  %v124_v59 = vld [vmem:[#allocation6 + $0x1c8] sm:$0xff]  ;;  %v126_v60 = vld [vmem:[#allocation6 + $0x1d8] sm:$0xff] }
  0x53   :  { %420 = vmatpush1.bf16.msra.mxu0 %v419_v51  ;;  %v115_v51 = vld [vmem:[#allocation6 + $0x180] sm:$0xff]  ;;  %v449_v62 = vpack.c.bf16 %v126_v60, %v124_v59  ;;  %v125_v0 = vld [vmem:[#allocation6 + $0x1d0] sm:$0xff]  ;;  %v128_v1 = vld [vmem:[#allocation6 + $0x1e8] sm:$0xff] }
  0x54   :  { %422 = vmatprep.subr.bf16.mxu0 %v421_v57  ;;  %v443_v55 = vpack.c.bf16 %v117_v52, %v115_v51  ;;  %v119_v57 = vld [vmem:[#allocation6 + $0x1a0] sm:$0xff]  ;;  %v130_v2 = vld [vmem:[#allocation6 + $0x1f8] sm:$0xff]  ;;  %v65_v8 = vld [vmem:[#allocation3] sm:$0xff] }
  0x55   :  { %476 = vmatpush3.bf16.msra.mxu1 %v475_v35  ;;  %v447_v61 = vpack.c.bf16 %v121_v58, %v119_v57  ;;  %v123_v63 = vld [vmem:[#allocation6 + $0x1c0] sm:$0xff]  ;;  %v453_v4 = vpack.c.bf16 %v130_v2, %v128_v1  ;;  %v230_v10 = vld [vmem:[#allocation8 + $0x68] sm:$0xff]  ;;  %v247_v12 = vld [vmem:[#allocation8 + $0xf0] sm:$0xff] }
  0x56   :  { %478 = vmatprep.subr.bf16.mxu1 %v477_v36  ;;  %v127_v5 = vld [vmem:[#allocation6 + $0x1e0] sm:$0xff]  ;;  %v248_v13 = vld [vmem:[#allocation8 + $0xf8] sm:$0xff]  ;;  %v131_v21 = vld [vmem:[%s687_s2] sm:$0x3]  ;;  %s600_s2 = smov [#allocation9]  }
  0x57   :  { %424 = vmatpush1.bf16.msra.mxu0 %v423_v3  ;;  %v451_v3 = vpack.c.bf16 %v125_v0, %v123_v63  ;;  %v229_v9 = vld [vmem:[#allocation8 + $0x60] sm:$0xff]  ;;  %v485_v14 = vpack.c.bf16 %v248_v13, %v247_v12  ;;  %v232_v16 = vld [vmem:[#allocation8 + $0x78] sm:$0xff]  ;;  %v357_v33 = vld [vmem:[%s689_s4] ss:$0 sm:$0xff]  ;;  %s347_s9 = sshll.u32 %s600_s2, 4  ;;  %s348_s9 = int_to_ptr.vmem [resolvable:$true] %s347_s9 }
  0x58   :  { %426 = vmatprep.subr.bf16.mxu0 %v425_v6  ;;  %v129_v6 = vld [vmem:[#allocation6 + $0x1f0] sm:$0xff]  ;;  %v483_v11 = vpack.c.bf16 %v230_v10, %v229_v9  ;;  %s565_s10 = scalar_lea.vmem %s348_s9, 128  ;;  %p570_p11 = scmp.lt.s32.totalorder %s348_s9, %s348_s9 }
  0x59   :  { %480 = vmatpush3.bf16.msra.mxu1 %v479_v47  ;;  %v455_v7 = vpack.c.bf16 %v129_v6, %v127_v5  ;;  %p566_p10 = scmp.ne.s32.totalorder %s348_s9, %s565_s10  ;;  %p571_p12 = scmp.lt.s32.totalorder %s565_s10, %s565_s10 }
  0x5a   :  { %482 = vmatprep.subr.bf16.mxu1 %v481_v48 }
  0x5b   :  { %428 = vmatpush1.bf16.msra.mxu0 %v427_v15  ;;  %v231_v15 = vld [vmem:[#allocation8 + $0x70] sm:$0xff]  ;;  %p572_p13 = por %p571_p12, %p570_p11 }
  0x5c   :  { %430 = vmatprep.subr.bf16.mxu0 %v429_v18  ;;  %v487_v17 = vpack.c.bf16 %v232_v16, %v231_v15  ;;  %v133_v18 = vlaneseq }
  0x5d   :  { %484 = vmatpush3.bf16.msra.mxu1 %v483_v11  ;;  %p573_p0 = pnand %p572_p13, %p566_p10 }
  0x5e   :  { %486 = vmatprep.subr.bf16.mxu1 %v485_v14  ;;  %v134_v19 = vshrl.u32 %v133_v18, 7  ;;  %v334_v38 = vand.u32 127, %v133_v18 }
  0x5f   :  { %432 = vmatpush1.bf16.msra.mxu0 %v431_v27 }
  0x60   :  { %434 = vmatprep.subr.bf16.mxu0 %v433_v30  ;;  %v135_v20 = vsub.s32 0, %v134_v19  ;;  %v139_v22 = vsub.s32 1, %v134_v19  ;;  %vm335_vm0 = vcmp.lt.s32.totalorder %v334_v38, 8 }
  0x61   :  { %488 = vmatpush3.bf16.msra.mxu1 %v487_v17 }
  0x62   :  { %v136_v23 = vrot.slane %v131_v21, %v135_v20  ;;  %v140_v24 = vrot.slane %v131_v21, %v139_v22 }
  0x63   :  { %436 = vmatpush1.bf16.msra.mxu0 %v435_v39 }
  0x64   :  { %438 = vmatprep.subr.bf16.mxu0 %v437_v42 }
  0x67   :  { %440 = vmatpush1.bf16.msra.mxu0 %v439_v49 }
  0x68   :  { %442 = vmatprep.subr.bf16.mxu0 %v441_v50 }
  0x6b   :  { %444 = vmatpush1.bf16.msra.mxu0 %v443_v55 }
  0x6c   :  { %446 = vmatprep.subr.bf16.mxu0 %v445_v56 }
  0x6f   :  { %448 = vmatpush1.bf16.msra.mxu0 %v447_v61 }
  0x70   :  { %450 = vmatprep.subr.bf16.mxu0 %v449_v62 }
  0x73   :  { %452 = vmatpush1.bf16.msra.mxu0 %v451_v3 }
  0x74   :  { %454 = vmatprep.subr.bf16.mxu0 %v453_v4 }
  0x77   :  { %456 = vmatpush1.bf16.msra.mxu0 %v455_v7 }
  0x7a   :  { %208 = vmatmul.mubr.f32.vlgmr.msra.gmra.mrb[0].mxu0 %v65_v8 }
 0x14d   :  { %v209_v25 = vpop.f32.mrb[0].mxu0 }
 0x14e   :  { %v210_v26 = vadd.f32 %v209_v25, %v136_v23  ;;  %v211_v27 = vpop.f32.mrb[1].mxu0 }
 0x14f   :  { %v212_v28 = vadd.f32 %v211_v27, %v140_v24 }
 0x150   :  { %v214_v30 = vmax.f32 %v210_v26, 0.0 }
 0x151   :  { %v215_v29 = vmax.f32 %v212_v28, 0.0 }
 0x153   :  { %313 = vmatprep.mubr.f32.mxu1 %v215_v29 }
 0x154   :  { %314 = vmatmul.mubr.f32.vlgmr.msra.gmra.mrb[0].mxu1 %v214_v30 }
 0x227   :  { %v390_v31 = vpop.f32.mrb[0].mxu1 }
 0x228   :  { %v391_v32 = vpop.f32.mrb[1].mxu1 }
 0x229   :  { %v392_v34 = vadd.f32 %v391_v32, %v390_v31 }
 0x22b   :  { %v332_v35 = vadd.f32 %v392_v34, %v357_v33 }
 0x22d   :  { %v336_v36 = vmul.f32 0.5, %v332_v35 }
 0x22f   :  { %v337_v37 = vmul.f32 1.442695, %v336_v36 }
 0x231   :  { %497 = vpow2.f32 %v337_v37 }
 0x23b   :  { %v498_v39 = vpop.eup %497 }
 0x23c   :  { %v339_v40 = vsel %vm335_vm0, %v332_v35, %v498_v39 }
 0x23d   :  { %340 = vst [vmem:[#allocation9] sm:$0xff] %v339_v40 }
 0x23e   :  { %576 = shalt.err (!%p573_p0)
}
 0x23f   :  { %s577_s12 = scalar_lea.hbm %s690_s5, 128 }
 0x240   :  { %p578_p1 = scmp.ne.s32.totalorder %s690_s5, %s577_s12  ;;  %p581_p2 = scmp.lt.u32.totalorder %s577_s12, %s690_s5 }
 0x242   :  { %p583_p3 = pnand %p581_p2, %p578_p1 }
 0x244   :  { %586 = shalt.err (!%p583_p3)
}
 0x245   :  { %350 = dma.vmem_to_hbm [thread:$0]  %s348_s9, 128, %s690_s5, [#allocation5]  }
 0x246   :  { %591 = dma.done.wait [#allocation5], 128  }
 0x247   :  { %592 = vsyncadd [#allocation5], 4294967168 }
 0x248   :  { %354 = vsyncpa [#allocation4], 1 }
 0x249   :  { %355 = vsyncpa [#allocation7], 1 }
 0x24a   :  { %356 = vsyncpa [#allocation5], 1 }

</bundles_post_ra>
